<compile_context>
chip_gen: v6e
topology: v6e:2x2x1
jax: 0.10.0
libtpu: 0.0.40
codegen_flags: <defaults>
</compile_context>

<pallas_src>
import math
import jax
import jax.numpy as jnp
from jax.experimental import pallas as pl
from jax.experimental.pallas import tpu as pltpu


def _quantize_kernel(x_ref, o_ref, *, scale, inv_scale, qmin, qmax):
    # Do the math in f32 for exact floor/clip; HBM traffic stays in input dtype.
    x = x_ref[...].astype(jnp.float32)
    q = jnp.clip(jnp.floor(x * scale), qmin, qmax)
    o_ref[...] = (q * inv_scale).astype(o_ref.dtype)   # inv_scale is a power of 2 -> exact


def _round_down(a, b):
    return (a // b) * b


def _min_sublanes(itemsize):
    # native TPU tiling: (8,128) f32, (16,128) bf16/f16, (32,128) int8/fp8
    return max(8, 32 // itemsize)


def _pick_block_rows(rows, lanes, itemsize, target_block_bytes):
    """Rows per block: multiple of the native sublane tile (or full dim),
    ~target_block_bytes big, and small enough to leave >= 2 grid steps
    (megacore / v7x dual-TensorCore) when the tensor allows it."""
    sub = _min_sublanes(itemsize)
    if rows < sub:
        return rows                                    # whole-dim block (no tiling on rows)
    br = max(sub, _round_down(target_block_bytes // (lanes * itemsize), sub))
    if rows > sub:
        half = max(sub, _round_down(-(-rows // 2), sub))
        br = min(br, half)                             # keep grid length >= 2
    return min(br, _round_down(rows, sub))


def quantize_feature(x, bitwidth=8, frac=4, signed=True, *,
                     target_block_bytes=2 << 20, donate_input=False):
    """Pallas implementation of QuantizeFeature.forward. Any shape, returns same shape/dtype."""
    assert bitwidth in (8, 16), f"bitwidth should be 8 or 16, got {bitwidth}"
    frac = int(frac)
    qmax = math.pow(2.0, bitwidth - 1) - 1 if signed else math.pow(2.0, bitwidth) - 1
    qmin = -math.pow(2.0, bitwidth - 1) if signed else 0.0
    scale = math.pow(2.0, frac)
    inv_scale = 1.0 / scale                            # exact reciprocal (power of two)

    orig_shape = x.shape
    dtype = x.dtype
    itemsize = jnp.dtype(dtype).itemsize
    sub = _min_sublanes(itemsize)
    n = x.size
    if n == 0:
        return x

    # --- lay the tensor out as a lane-dense 2D slab (no copy when aligned) ---
    padded = False
    if n % 128 == 0:
        lanes = 128
        for cand in (2048, 1024, 512, 256):            # widest lane count that keeps rows >= sub
            if n % cand == 0 and (n // cand) >= sub:
                lanes = cand
                break
        rows = n // lanes
        x2d = x.reshape(rows, lanes)                   # metadata-only reshape
    else:
        # Ragged element count (rare for activation tensors): pad to an aligned slab.
        # TODO(synk): mask the tail in-kernel (scalar-prefetch n + masked store) to drop this copy.
        padded = True
        lanes = 128
        rows = -(-n // lanes)
        rows = -(-rows // sub) * sub
        x2d = jnp.pad(x.reshape(-1), (0, rows * lanes - n)).reshape(rows, lanes)

    block_rows = _pick_block_rows(rows, lanes, itemsize, target_block_bytes)
    grid = (pl.cdiv(rows, block_rows),)

    kernel = lambda x_ref, o_ref: _quantize_kernel(
        x_ref, o_ref, scale=scale, inv_scale=inv_scale, qmin=qmin, qmax=qmax)

    out = pl.pallas_call(
        kernel,
        out_shape=jax.ShapeDtypeStruct((rows, lanes), dtype),
        grid_spec=pltpu.PrefetchScalarGridSpec(
            num_scalar_prefetch=0,
            grid=grid,
            in_specs=[pl.BlockSpec((block_rows, lanes), lambda i: (i, 0))],
            out_specs=pl.BlockSpec((block_rows, lanes), lambda i: (i, 0)),
        ),
        compiler_params=pltpu.CompilerParams(
            dimension_semantics=("parallel",)),
        input_output_aliases=({0: 0} if donate_input else {}),
    )(x2d)

    if padded:
        out = out.reshape(-1)[:n]
    return out.reshape(orig_shape)


def _reference(x, bitwidth=8, frac=4, signed=True):
    frac = int(frac)
    qmax = math.pow(2.0, bitwidth - 1) - 1 if signed else math.pow(2.0, bitwidth) - 1
    qmin = -math.pow(2.0, bitwidth - 1) if signed else 0.0
    scale = math.pow(2.0, frac)
    xf = x.astype(jnp.float32)
    q = jnp.clip(jnp.floor(xf * scale), qmin, qmax)
    return (q / scale).astype(x.dtype)


if __name__ == "__main__":
    key = jax.random.PRNGKey(0)
    k0, k1, k2 = jax.random.split(key, 3)

    # NCHW input, same convention as the PyTorch module (aligned fast path, f32).
    x = jax.random.normal(k0, (2, 4, 16, 16), dtype=jnp.float32) * 4.0
    y = quantize_feature(x, bitwidth=8, frac=4, signed=True)
    jax.block_until_ready(y)
    assert y.shape == x.shape and y.dtype == x.dtype
    assert jnp.array_equal(y, _reference(x, bitwidth=8, frac=4, signed=True)), "mismatch (f32 aligned)"

    # Ragged element count -> exercises the pad fallback path.
    xr = jax.random.normal(k1, (2, 3, 7, 5), dtype=jnp.float32) * 8.0
    yr = quantize_feature(xr, bitwidth=16, frac=8, signed=True)
    jax.block_until_ready(yr)
    assert jnp.array_equal(yr, _reference(xr, bitwidth=16, frac=8, signed=True)), "mismatch (ragged)"

    # bf16 input stays bf16 on the HBM side (no wrapper upcast).
    xb = (jax.random.normal(k2, (2, 4, 16, 16), dtype=jnp.float32) * 4.0).astype(jnp.bfloat16)
    yb = quantize_feature(xb, bitwidth=8, frac=4, signed=False)
    jax.block_until_ready(yb)
    assert yb.dtype == jnp.bfloat16
    assert jnp.array_equal(yb, _reference(xb, bitwidth=8, frac=4, signed=False)), "mismatch (bf16)"

    print("KERNEL_OK")
</pallas_src>

<mosaic_0001>
module attributes {stable_mosaic.version = 11 : i64} {
  func.func @_lambda_(%arg0: i32, %arg1: memref<8x256xf32, #tpu.memory_space<vmem>>, %arg2: memref<8x256xf32, #tpu.memory_space<vmem>>) attributes {dimension_semantics = [#tpu.dimension_semantics<parallel>], iteration_bounds = array<i64: 1>, scalar_prefetch = 0 : i64, scratch_operands = 0 : i64, tpu.core_type = #tpu.core_type<tc>, window_params = [{transform_indices = @transform_0, window_bounds = array<i64: 8, 256>}, {transform_indices = @transform_1, window_bounds = array<i64: 8, 256>}]} {
    %c0 = arith.constant 0 : index
    %c0_0 = arith.constant 0 : index
    %0 = vector.load %arg1[%c0, %c0_0] : memref<8x256xf32, #tpu.memory_space<vmem>>, vector<8x256xf32>
    %cst = arith.constant 1.600000e+01 : f32
    %1 = vector.broadcast %cst : f32 to vector<8x256xf32>
    %2 = arith.mulf %0, %1 : vector<8x256xf32>
    %3 = math.floor %2 : vector<8x256xf32>
    %cst_1 = arith.constant -1.280000e+02 : f32
    %cst_2 = arith.constant 1.270000e+02 : f32
    %4 = vector.broadcast %cst_1 : f32 to vector<8x256xf32>
    %5 = arith.maximumf %4, %3 : vector<8x256xf32>
    %6 = vector.broadcast %cst_2 : f32 to vector<8x256xf32>
    %7 = arith.minimumf %6, %5 : vector<8x256xf32>
    %cst_3 = arith.constant 6.250000e-02 : f32
    %8 = vector.broadcast %cst_3 : f32 to vector<8x256xf32>
    %9 = arith.mulf %7, %8 : vector<8x256xf32>
    %c0_4 = arith.constant 0 : index
    %c0_5 = arith.constant 0 : index
    %10 = vector.load %arg2[%c0_4, %c0_5] : memref<8x256xf32, #tpu.memory_space<vmem>>, vector<8x256xf32>
    tpu.vector_store %arg2[%c0_4, %c0_5], %9 {strides = array<i32>} : memref<8x256xf32, #tpu.memory_space<vmem>>, vector<8x256xf32>,
    return
  }
  func.func @transform_0(%arg0: i32) -> (i32, i32) {
    %c0_i32 = arith.constant 0 : i32
    %c0_i32_0 = arith.constant 0 : i32
    return %arg0, %c0_i32 : i32, i32
  }
  func.func @transform_1(%arg0: i32) -> (i32, i32) {
    %c0_i32 = arith.constant 0 : i32
    %c0_i32_0 = arith.constant 0 : i32
    return %arg0, %c0_i32 : i32, i32
  }
}

</mosaic_0001>

<bundles_post_ra>
// kernel: tpu_custom_call.1
= control target key start
LH: loop header
LB: loop body
LE: loop exit
PB: predicated region body
PF: predicated region fallthrough
CT: control target
= control target key end

     0   :  { %6 = vsyncpa [#allocation3], 0  ;;  %s114_s0 = inlined_call_operand.hbm [shape: f32[8,256], index: 0, kind: input, shape index: {}]   ;;  %s115_s1 = inlined_call_operand.hbm [shape: f32[8,256], index: 1, kind: output, shape index: {}]  }
   0x1   :  { %7 = vsyncpa [#allocation4], 0  ;;  %s96_s6 = smov [#allocation2]  }
   0x2   :  { %s14_s7 = sshll.u32 %s96_s6, 4  ;;  %s15_s7 = int_to_ptr.vmem [resolvable:$true] %s14_s7 }
   0x3   :  { %s60_s8 = scalar_lea.vmem %s15_s7, 256  ;;  %p65_p1 = scmp.lt.s32.totalorder %s15_s7, %s15_s7 }
   0x4   :  { %p61_p0 = scmp.ne.s32.totalorder %s15_s7, %s60_s8  ;;  %p66_p2 = scmp.lt.s32.totalorder %s60_s8, %s60_s8 }
   0x6   :  { %p67_p3 = por %p66_p2, %p65_p1 }
   0x8   :  { %p68_p4 = pnand %p67_p3, %p61_p0 }
   0xa   :  { %71 = shalt.err (!%p68_p4)
}
   0xb   :  { %17 = dma.hbm_to_vmem [thread:$0]  %s114_s0, 256, %s15_s7, [#allocation3]  }
   0xc   :  { %92 = dma.done.wait [#allocation3], 256  }
   0xd   :  { %93 = vsyncadd [#allocation3], 4294967040  ;;  %v21_v0 = vld [vmem:[#allocation2] sm:$0xff]  ;;  %v22_v1 = vld [vmem:[#allocation2 + $0x8] sm:$0xff]  ;;  %s97_s11 = smov [#allocation5]  }
   0xe   :  { %v23_v2 = vmul.f32 16.0, %v21_v0  ;;  %v24_v3 = vmul.f32 16.0, %v22_v1  ;;  %s41_s12 = sshll.u32 %s97_s11, 4  ;;  %s42_s12 = int_to_ptr.vmem [resolvable:$true] %s41_s12 }
   0xf   :  { %s72_s0 = scalar_lea.vmem %s42_s12, 256  ;;  %p77_p6 = scmp.lt.s32.totalorder %s42_s12, %s42_s12 }
  0x10   :  { %v25_v4 = vfloor.f32 %v23_v2  ;;  %v26_v5 = vfloor.f32 %v24_v3  ;;  %p73_p5 = scmp.ne.s32.totalorder %s42_s12, %s72_s0  ;;  %p78_p7 = scmp.lt.s32.totalorder %s72_s0, %s72_s0 }
  0x12   :  { %v27_v6 = vmax.f32 %v25_v4, -128.0  ;;  %v28_v7 = vmax.f32 %v26_v5, -128.0  ;;  %p79_p8 = por %p78_p7, %p77_p6 }
  0x14   :  { %v29_v8 = vmin.f32 %v27_v6, 127.0  ;;  %v30_v9 = vmin.f32 %v28_v7, 127.0  ;;  %p80_p9 = pnand %p79_p8, %p73_p5 }
  0x16   :  { %v31_v10 = vmul.f32 0.0625, %v29_v8  ;;  %v32_v11 = vmul.f32 0.0625, %v30_v9 }
  0x18   :  { %33 = vst [vmem:[#allocation5] sm:$0xff] %v31_v10  ;;  %34 = vst [vmem:[#allocation5 + $0x8] sm:$0xff] %v32_v11 }
  0x19   :  { %83 = shalt.err (!%p80_p9)
}
  0x1a   :  { %44 = dma.vmem_to_hbm [thread:$0]  %s42_s12, 256, %s115_s1, [#allocation4]  }
  0x1b   :  { %94 = dma.done.wait [#allocation4], 256  }
  0x1c   :  { %95 = vsyncadd [#allocation4], 4294967040 }
  0x1d   :  { %48 = vsyncpa [#allocation3], 1 }
  0x1e   :  { %49 = vsyncpa [#allocation4], 1 }

</bundles_post_ra>
